<compile_context>
chip_gen: v5e
topology: v5e:2x2
jax: 0.10.0
libtpu: 0.0.40
codegen_flags: <defaults>
</compile_context>

<pallas_src>
import functools

import jax
import jax.numpy as jnp
from jax.experimental import pallas as pl
from jax.experimental.pallas import tpu as pltpu

# Module-level constants from the original file (standard learned-compression values).
PROBA_MIN = 1e-6
PROBA_MAX = 1.0 - 1e-6

_MAX_LANE_WIDTH = 8192                  # cap on the lane-dense last dim (multiple of 128)
_MIN_PALLAS_ELEMENTS = 1 << 15          # below this the fused XLA elementwise wins
_MiB = 1024 * 1024


def _device_kind():
    try:
        return jax.devices()[0].device_kind.lower()
    except Exception:  # pragma: no cover - never let detection break the op
        return ""


def _default_block_bytes(kind):
    # v6e / v7x: ~4 MiB blocks (double-buffered in+out = 16 MiB, fits 32 MiB scoped
    # VMEM and leaves >2x headroom under v7x's 64 MiB physical VMEM).
    # v5e / unknown: keep 2 MiB (16 MiB scoped default; per-step overhead already hidden).
    if any(tag in kind for tag in ("v6", "v7", "7x")):
        return 4 * _MiB
    return 2 * _MiB


def _supports_bf16_math(kind):
    # v5e has no bf16 VPU/EUP; v6e/v7x do.
    return any(tag in kind for tag in ("v6", "v7", "7x"))


def _largest_lane_divisor(total, max_cols):
    """Largest multiple-of-128 divisor of `total` that is <= max_cols, else 0."""
    if total <= 0 or total % 128 != 0:
        return 0
    m = total // 128
    limit = max(1, max_cols // 128)
    for d in range(min(limit, m), 0, -1):
        if m % d == 0:
            return 128 * d
    return 128  # unreachable for m >= 1 (d=1 always divides)


def _xla_fallback(prob_x, compute_dtype):
    p = jnp.clip(prob_x.astype(compute_dtype), PROBA_MIN, PROBA_MAX)
    return (-jnp.log2(p)).astype(prob_x.dtype)


def _entropy_coder_kernel(prob_ref, rate_ref, *, compute_dtype):
    # clamp on the VPU, log2 on the EUP (separate bundle slot -> effectively free
    # relative to the HBM stream). compute_dtype is f32, or bf16 natively on v6e/v7x.
    p = prob_ref[...].astype(compute_dtype)
    p = jnp.clip(p, PROBA_MIN, PROBA_MAX)
    rate_ref[...] = (-jnp.log2(p)).astype(rate_ref.dtype)


def entropy_coder_forward(prob_x, x=None, *,
                          block_bytes=None,
                          max_lane_width=_MAX_LANE_WIDTH,
                          min_pallas_elements=_MIN_PALLAS_ELEMENTS,
                          donate_prob=False):
    """Pallas implementation of EntropyCoder.forward.

    prob_x: probabilities, any shape (e.g. NCHW). x is unused (API parity with
    the PyTorch module). Returns rate with the same shape/dtype as prob_x.
    """
    del x  # unused in the reference forward pass

    orig_shape = prob_x.shape
    dtype = prob_x.dtype
    total = prob_x.size
    itemsize = jnp.dtype(dtype).itemsize

    kind = _device_kind()
    if block_bytes is None:
        block_bytes = _default_block_bytes(kind)

    # Compute dtype: f32 always correct; bf16 natively only where the VPU/EUP support it.
    if jnp.dtype(dtype) == jnp.dtype(jnp.float32):
        compute_dtype = jnp.float32
    elif jnp.dtype(dtype) == jnp.dtype(jnp.bfloat16) and _supports_bf16_math(kind):
        compute_dtype = jnp.bfloat16
    else:
        compute_dtype = jnp.float32

    # Zero-copy lane-dense layout: cols must divide `total` and be a multiple of 128.
    cols = _largest_lane_divisor(total, max_lane_width)

    # Fallbacks: tiny tensors (kernel launch overhead loses to fused XLA) and totals
    # that are not a multiple of 128 (no zero-copy lane-dense layout exists; the
    # fused XLA elementwise already moves the ideal 2N bytes in one pass).
    if total == 0 or total < min_pallas_elements or cols == 0:
        return _xla_fallback(prob_x, compute_dtype)

    rows = total // cols

    # Row block sized against the VMEM budget, rounded to the dtype's sublane packing
    # (8 rows f32, 16 bf16, 32 int8/fp8) so every block is a legal unpadded tile.
    sublane_pack = max(8, 32 // itemsize)
    bytes_per_row = cols * itemsize
    row_block = block_bytes // bytes_per_row
    row_block = max(sublane_pack, (row_block // sublane_pack) * sublane_pack)
    if row_block >= rows:
        row_block = rows  # full-extent block is always legal, even if not %sublane_pack
    grid = (pl.cdiv(rows, row_block),)

    # Raise the scoped-VMEM limit only when we actually use the larger (v6e/v7x) blocks.
    vmem_limit = 32 * _MiB if block_bytes > 2 * _MiB else None

    cost = pl.CostEstimate(
        flops=total,                        # the clamp
        transcendentals=total,              # the log2 (EUP)
        bytes_accessed=2 * total * itemsize,
    )

    p2d = prob_x.reshape(rows, cols)        # contiguous -> free reshape, no copy

    rate2d = pl.pallas_call(
        functools.partial(_entropy_coder_kernel, compute_dtype=compute_dtype),
        out_shape=jax.ShapeDtypeStruct((rows, cols), dtype),
        grid=grid,
        in_specs=[pl.BlockSpec((row_block, cols), lambda i: (i, 0))],
        out_specs=pl.BlockSpec((row_block, cols), lambda i: (i, 0)),
        compiler_params=pltpu.CompilerParams(
            dimension_semantics=("parallel",),
            vmem_limit_bytes=vmem_limit,
        ),
        cost_estimate=cost,
        input_output_aliases={0: 0} if donate_prob else {},
    )(p2d)

    return rate2d.reshape(orig_shape)


def _reference(prob_x):
    p = jnp.clip(prob_x.astype(jnp.float32), PROBA_MIN, PROBA_MAX)
    return (-jnp.log2(p)).astype(prob_x.dtype)


if __name__ == "__main__":
    key = jax.random.PRNGKey(0)
    k1, k2 = jax.random.split(key)

    B, C, H, W = 2, 4, 16, 16
    # Probabilities in (0, 1); include extreme values to exercise the clamp.
    prob_x = jax.random.uniform(k1, (B, C, H, W), dtype=jnp.float32)
    prob_x = prob_x.at[0, 0, 0, 0].set(0.0)
    prob_x = prob_x.at[1, 3, 15, 15].set(1.0)
    x = jax.random.normal(k2, (B, C, H, W), dtype=jnp.float32)  # unused, API parity

    # Force the Pallas path even at this small test size.
    rate = entropy_coder_forward(prob_x, x, min_pallas_elements=0)
    rate = jax.block_until_ready(rate)
    assert rate.shape == prob_x.shape and rate.dtype == prob_x.dtype
    assert jnp.allclose(rate, _reference(prob_x), rtol=1e-6, atol=1e-5), "mismatch (base)"

    # Multi-block grid with a masked (ragged) last row block: pin the lane width to
    # 128 and shrink the block budget -> rows=80 tiled into 24-row blocks (grid=4).
    prob_b = jax.random.uniform(jax.random.PRNGKey(1), (2, 4, 32, 40), dtype=jnp.float32)
    rate_b = entropy_coder_forward(prob_b, None, min_pallas_elements=0,
                                   max_lane_width=128, block_bytes=24 * 128 * 4)
    rate_b = jax.block_until_ready(rate_b)
    assert jnp.allclose(rate_b, _reference(prob_b), rtol=1e-6, atol=1e-5), "mismatch (ragged)"

    # Total not a multiple of 128 -> no zero-copy lane-dense layout; exact XLA
    # fallback (single fused 2N-byte pass, no pad/slice copies).
    prob_c = jax.random.uniform(jax.random.PRNGKey(2), (1, 3, 7, 11), dtype=jnp.float32)
    rate_c = jax.block_until_ready(entropy_coder_forward(prob_c, None, min_pallas_elements=0))
    assert jnp.allclose(rate_c, _reference(prob_c), rtol=1e-6, atol=1e-5), "mismatch (non-128)"

    # bf16 input: dtype-aware sublane packing (16) and native bf16 math on v6e/v7x
    # (f32 upcast on v5e). Tolerances account for bf16 clamp/log2 precision.
    prob_d = jax.random.uniform(jax.random.PRNGKey(3), (2, 4, 16, 16),
                                dtype=jnp.float32).astype(jnp.bfloat16)
    rate_d = jax.block_until_ready(entropy_coder_forward(prob_d, None, min_pallas_elements=0))
    assert rate_d.dtype == jnp.bfloat16
    assert jnp.allclose(rate_d.astype(jnp.float32),
                        _reference(prob_d).astype(jnp.float32),
                        rtol=2e-2, atol=2e-2), "mismatch (bf16)"

    print("KERNEL_OK")
</pallas_src>

<mosaic_0001>
module attributes {stable_mosaic.version = 11 : i64} {
  func.func @_entropy_coder_kernel(%arg0: i32, %arg1: memref<1x2048xf32, #tpu.memory_space<vmem>>, %arg2: memref<1x2048xf32, #tpu.memory_space<vmem>>) attributes {dimension_semantics = [#tpu.dimension_semantics<parallel>], iteration_bounds = array<i64: 1>, scalar_prefetch = 0 : i64, scratch_operands = 0 : i64, tpu.core_type = #tpu.core_type<tc>, window_params = [{transform_indices = @transform_0, window_bounds = array<i64: 1, 2048>}, {transform_indices = @transform_1, window_bounds = array<i64: 1, 2048>}]} {
    %c0 = arith.constant 0 : index
    %c0_0 = arith.constant 0 : index
    %0 = vector.load %arg1[%c0, %c0_0] : memref<1x2048xf32, #tpu.memory_space<vmem>>, vector<1x2048xf32>
    %cst = arith.constant 9.99999997E-7 : f32
    %cst_1 = arith.constant 0.999998986 : f32
    %1 = vector.broadcast %cst : f32 to vector<1x2048xf32>
    %2 = arith.maximumf %1, %0 : vector<1x2048xf32>
    %3 = vector.broadcast %cst_1 : f32 to vector<1x2048xf32>
    %4 = arith.minimumf %3, %2 : vector<1x2048xf32>
    %5 = math.log %4 : vector<1x2048xf32>
    %cst_2 = arith.constant 2.000000e+00 : f32
    %6 = math.log %cst_2 : f32
    %7 = vector.broadcast %6 : f32 to vector<1x2048xf32>
    %8 = arith.divf %5, %7 : vector<1x2048xf32>
    %cst_3 = arith.constant 0.000000e+00 : f32
    %9 = vector.broadcast %cst_3 : f32 to vector<1x2048xf32>
    %10 = arith.subf %9, %8 : vector<1x2048xf32>
    %c0_4 = arith.constant 0 : index
    %c0_5 = arith.constant 0 : index
    %11 = vector.load %arg2[%c0_4, %c0_5] : memref<1x2048xf32, #tpu.memory_space<vmem>>, vector<1x2048xf32>
    tpu.vector_store %arg2[%c0_4, %c0_5], %10 {strides = array<i32>} : memref<1x2048xf32, #tpu.memory_space<vmem>>, vector<1x2048xf32>,
    return
  }
  func.func @transform_0(%arg0: i32) -> (i32, i32) {
    %c0_i32 = arith.constant 0 : i32
    %c0_i32_0 = arith.constant 0 : i32
    return %arg0, %c0_i32 : i32, i32
  }
  func.func @transform_1(%arg0: i32) -> (i32, i32) {
    %c0_i32 = arith.constant 0 : i32
    %c0_i32_0 = arith.constant 0 : i32
    return %arg0, %c0_i32 : i32, i32
  }
}

</mosaic_0001>

<bundles_post_ra>
// kernel: tpu_custom_call.1
= control target key start
LH: loop header
LB: loop body
LE: loop exit
PB: predicated region body
PF: predicated region fallthrough
CT: control target
= control target key end

     0   :  { %6 = vsyncpa [#allocation3], 0  ;;  %s143_s0 = inlined_call_operand.hbm [shape: f32[1,2048], index: 0, kind: input, shape index: {}]   ;;  %s144_s1 = inlined_call_operand.hbm [shape: f32[1,2048], index: 1, kind: output, shape index: {}]  }
   0x1   :  { %7 = vsyncpa [#allocation4], 0  ;;  %s13_s8 = sshll.u32 %s143_s0, 4  ;;  %s124_s9 = smov [#allocation2]   ;;  %s14_s8 = int_to_ptr.hbm [resolvable:$true] %s13_s8 }
   0x2   :  { %s15_s10 = sshll.u32 %s124_s9, 4  ;;  %s16_s10 = int_to_ptr.vmem [resolvable:$true] %s15_s10 }
   0x3   :  { %18 = dma.hbm_to_vmem [thread:$0]  %s14_s8, 256, %s16_s10, [#allocation3]  }
   0x4   :  { %120 = dma.done.wait [#allocation3], 256  }
   0x5   :  { %121 = vsyncadd [#allocation3], 4294967040  ;;  %v125_v0 = vmov 0.6931472   ;;  %v23_v2 = vld [vmem:[#allocation2] sm:$0xff]  ;;  %v24_v3 = vld [vmem:[#allocation2 + $0x8] sm:$0xff] }
   0x6   :  { %66 = vrcp.f32 %v125_v0  ;;  %v25_v4 = vmax.f32 %v23_v2, 1e-06  ;;  %v26_v6 = vmax.f32 %v24_v3, 1e-06  ;;  %s126_s0 = smov [#allocation5]   ;;  %s53_s14 = sshll.u32 %s144_s1, 4  ;;  %s54_s14 = int_to_ptr.hbm [resolvable:$true] %s53_s14 }
   0x7   :  { %s51_s11 = sshll.u32 %s126_s0, 4  ;;  %s52_s11 = int_to_ptr.vmem [resolvable:$true] %s51_s11 }
   0x8   :  { %v27_v7 = vmin.f32 %v25_v4, 0.999999  ;;  %v28_v9 = vmin.f32 %v26_v6, 0.999999 }
   0xa   :  { %68 = vlog2.f32 %v27_v7 }
   0xb   :  { %70 = vlog2.f32 %v28_v9 }
   0xc   :  { %v67_v1 = vpop.eup %66 }
   0xd   :  { %v34_v5 = vmul.f32 0.6931472, %v67_v1  ;;  %vm38_vm0 = vweird.f32 %v67_v1 }
   0xf   :  { %v35_v8 = vsub.f32 1.0, %v34_v5 }
  0x10   :  { %v69_v12 = vpop.eup %68 }
  0x11   :  { %v36_v10 = vmul.f32 %v67_v1, %v35_v8  ;;  %v71_v14 = vpop.eup %70  ;;  %v30_v15 = vmul.f32 0.6931472, %v69_v12 }
  0x12   :  { %v32_v16 = vmul.f32 0.6931472, %v71_v14 }
  0x13   :  { %v37_v11 = vadd.f32 %v67_v1, %v36_v10 }
  0x15   :  { %v39_v13 = vsel %vm38_vm0, %v67_v1, %v37_v11 }
  0x16   :  { %v40_v17 = vmul.f32 %v39_v13, %v30_v15  ;;  %v41_v18 = vmul.f32 %v39_v13, %v32_v16 }
  0x18   :  { %v42_v19 = vsub.f32 0.0, %v40_v17  ;;  %v43_v20 = vsub.f32 0.0, %v41_v18 }
  0x1a   :  { %44 = vst [vmem:[#allocation5] sm:$0xff] %v42_v19 }
  0x1b   :  { %45 = vst [vmem:[#allocation5 + $0x8] sm:$0xff] %v43_v20 }
  0x1c   :  { %56 = dma.vmem_to_hbm [thread:$0]  %s52_s11, 256, %s54_s14, [#allocation4]  }
  0x1d   :  { %122 = dma.done.wait [#allocation4], 256  }
  0x1e   :  { %123 = vsyncadd [#allocation4], 4294967040 }
  0x1f   :  { %61 = vsyncpa [#allocation3], 1 }
  0x20   :  { %62 = vsyncpa [#allocation4], 1 }

</bundles_post_ra>
